<compile_context>
chip_gen: v5e
topology: v5e:2x2
jax: 0.10.0
libtpu: 0.0.40
codegen_flags: <defaults>
</compile_context>

<pallas_src>
import functools
import math

import jax
import jax.numpy as jnp
from jax.experimental import pallas as pl
from jax.experimental.pallas import tpu as pltpu


def _round_up(x, m):
    return -(-x // m) * m


# ----------------------------------------------------------------------------
# Pallas kernel: fused 3-head MLP forward
# ----------------------------------------------------------------------------
def ppo_fused_kernel(state_ref, w_ref, b_ref, out_ref, *,
                     sd_pad, lanes, out_pad, action_dim):
    f32 = jnp.float32

    def elu(z):
        # ELU(alpha=1). Clamp the exp argument: jnp.where evaluates both
        # branches and we never want a (discarded) inf.
        return jnp.where(z > 0.0, z, jnp.exp(jnp.minimum(z, 0.0)) - 1.0)

    def mm(a, w):
        # MXU matmul: operand dtype follows the packed-weight dtype (f32 or
        # bf16); accumulation is always f32.  Weights are already in their
        # compute dtype, so no per-step weight cast on the VPU.
        return jnp.dot(a.astype(w.dtype), w, preferred_element_type=f32)

    x = state_ref[...].astype(f32)                                    # (bt, sd_pad)

    # Static, sublane/lane-aligned slices of the resident packed weight buffer.
    w1 = w_ref[pl.ds(0, sd_pad), :]                                   # (sd_pad, lanes)
    w2 = w_ref[pl.ds(sd_pad, lanes), :]                               # (lanes, lanes)
    w3 = w_ref[pl.ds(sd_pad + lanes, lanes), pl.ds(0, out_pad)]       # (lanes, out_pad)

    bias = b_ref[...]                                                 # (8, lanes) f32
    b1 = bias[0:1, :]                                                 # (1, lanes)
    b2 = bias[1:2, :]                                                 # (1, lanes)
    b3 = bias[2:3, 0:out_pad]                                         # (1, out_pad)

    # Three wide matmuls cover all three heads at once.
    h = elu(mm(x, w1) + b1)                                           # (bt, lanes) f32
    h = elu(mm(h, w2) + b2)                                           # (bt, lanes) f32
    y = mm(h, w3) + b3                                                # (bt, out_pad) f32
    # y columns: [0, action_dim) actor logits, action_dim -> v_in,
    #            action_dim+1 -> v_ex, rest zero padding.

    # Masked softmax over the actor columns only (f32 throughout).
    lane_idx = jax.lax.broadcasted_iota(jnp.int32, y.shape, 1)
    amask = lane_idx < action_dim
    neg = jnp.float32(-1e30)
    m = jnp.max(jnp.where(amask, y, neg), axis=-1, keepdims=True)
    e = jnp.where(amask, jnp.exp(jnp.minimum(y - m, 0.0)), 0.0)
    d = jnp.sum(e, axis=-1, keepdims=True)
    r = pl.reciprocal(d, approx=True)          # EUP vrcp (free slot)
    r = r * (2.0 - d * r)                      # one Newton step -> ~f32 accuracy
    out = jnp.where(amask, e * r, y)           # probs in actor cols, raw values elsewhere

    out_ref[...] = out.astype(out_ref.dtype)   # single lane-dense (bt, 128) store


# ----------------------------------------------------------------------------
# Parameter packing (done once, outside the per-step forward)
# ----------------------------------------------------------------------------
def pack_ppo_params(params, state_dim, param_dtype=jnp.float32):
    """Pack the 18 per-head tensors into one (rows, lanes) weight buffer in
    `param_dtype` (the MXU compute dtype) plus a tiny (8, lanes) f32 bias tile.

    params: (aw1,ab1,aw2,ab2,aw3,ab3, iw1,...,ib3, ew1,...,eb3) with weights
    stored as (in_features, out_features) and biases as (1, out_features).
    """
    (aw1, ab1, aw2, ab2, aw3, ab3,
     iw1, ib1, iw2, ib2, iw3, ib3,
     ew1, eb1, ew2, eb2, ew3, eb3) = params

    hidden = aw1.shape[1]
    action_dim = aw3.shape[1]
    h3 = 3 * hidden
    sd_pad = _round_up(state_dim, 8)
    out_pad = _round_up(action_dim + 2, 128)   # lane-dense output slab width
    lanes = max(h3, out_pad)
    rows = sd_pad + 2 * lanes
    f32 = jnp.float32

    W = jnp.zeros((rows, lanes), f32)

    # layer 1: fused column-concat  x @ W1 -> [h_actor | h_vin | h_vex]
    W = W.at[:state_dim, :h3].set(jnp.concatenate([aw1, iw1, ew1], axis=1))

    # layer 2: block-diagonal (one wide matmul instead of three 64x64)
    r0 = sd_pad
    W = W.at[r0 + 0 * hidden:r0 + 1 * hidden, 0 * hidden:1 * hidden].set(aw2)
    W = W.at[r0 + 1 * hidden:r0 + 2 * hidden, 1 * hidden:2 * hidden].set(iw2)
    W = W.at[r0 + 2 * hidden:r0 + 3 * hidden, 2 * hidden:3 * hidden].set(ew2)

    # layer 3: block-structured -> [actor logits | v_in | v_ex | 0 pad]
    r0 = sd_pad + lanes
    W = W.at[r0 + 0 * hidden:r0 + 1 * hidden, 0:action_dim].set(aw3)
    W = W.at[r0 + 1 * hidden:r0 + 2 * hidden, action_dim:action_dim + 1].set(iw3)
    W = W.at[r0 + 2 * hidden:r0 + 3 * hidden, action_dim + 1:action_dim + 2].set(ew3)

    W = W.astype(param_dtype)                   # pack in the MXU compute dtype

    # biases: one aligned (8, lanes) f32 tile (kept f32 for exact bias adds)
    B = jnp.zeros((8, lanes), f32)
    B = B.at[0, :h3].set(jnp.concatenate([ab1, ib1, eb1], axis=1)[0])
    B = B.at[1, :h3].set(jnp.concatenate([ab2, ib2, eb2], axis=1)[0])
    B = B.at[2, 0:action_dim].set(ab3[0])
    B = B.at[2, action_dim].set(ib3[0, 0])
    B = B.at[2, action_dim + 1].set(eb3[0, 0])

    meta = dict(state_dim=state_dim, sd_pad=sd_pad, lanes=lanes,
                out_pad=out_pad, action_dim=action_dim)
    return W, B, meta


# ----------------------------------------------------------------------------
# Forward wrapper
# ----------------------------------------------------------------------------
def ppo_model_forward(state, weights, biases, *, state_dim, sd_pad, lanes,
                      out_pad, action_dim, out_dtype=jnp.float32,
                      block_b=1024, core_parallel=False):
    """Returns (actor_probs, value_in, value_ex) like PPO_Model.forward."""
    B = state.shape[0]
    assert state.shape[1] == state_dim

    # Pad feature dim to the packed layout width (no-op when already aligned).
    if state.shape[1] != sd_pad:
        state = jnp.pad(state, ((0, 0), (0, sd_pad - state.shape[1])))

    # Batch tiling: tiles are multiples of 8 sublanes; weights stay resident.
    # Large default tile (1024) amortizes the ~0.35 us per-grid-step overhead.
    bt = _round_up(min(block_b, _round_up(B, 8)), 8)
    b_pad = _round_up(B, bt)
    if b_pad != B:
        state = jnp.pad(state, ((0, b_pad - B), (0, 0)))
    grid = (b_pad // bt,)

    kernel = functools.partial(
        ppo_fused_kernel, sd_pad=sd_pad, lanes=lanes, out_pad=out_pad,
        action_dim=action_dim)

    # Advisory cost estimate so XLA overlaps this custom call with neighbors.
    out_itemsize = jnp.dtype(out_dtype).itemsize
    flops = 2 * b_pad * (sd_pad * lanes + lanes * lanes + lanes * out_pad)
    transcendentals = b_pad * (2 * lanes + out_pad)
    bytes_accessed = (b_pad * sd_pad * 4
                      + b_pad * out_pad * out_itemsize
                      + weights.size * weights.dtype.itemsize
                      + biases.size * 4)

    # v7x: opt into a real 2-TensorCore split of the batch axis.
    # TODO(synk): flip core_parallel=True by default once running on v7x.
    dim_sem = (pltpu.CORE_PARALLEL,) if core_parallel else ("parallel",)

    out = pl.pallas_call(
        kernel,
        out_shape=jax.ShapeDtypeStruct((b_pad, out_pad), out_dtype),
        grid=grid,
        in_specs=[
            pl.BlockSpec((bt, sd_pad), lambda i: (i, 0)),    # state tile (pipelined)
            pl.BlockSpec(weights.shape, lambda i: (0, 0)),   # weights resident in VMEM
            pl.BlockSpec(biases.shape, lambda i: (0, 0)),    # f32 bias tile resident
        ],
        out_specs=pl.BlockSpec((bt, out_pad), lambda i: (i, 0)),
        compiler_params=pltpu.CompilerParams(dimension_semantics=dim_sem),
        cost_estimate=pl.CostEstimate(flops=flops,
                                      transcendentals=transcendentals,
                                      bytes_accessed=bytes_accessed),
    )(state, weights, biases)

    probs = out[:B, :action_dim]
    v_in = out[:B, action_dim:action_dim + 1]
    v_ex = out[:B, action_dim + 1:action_dim + 2]
    return probs, v_in, v_ex


# ----------------------------------------------------------------------------
# Deterministic parameter init (mirrors lets_init_weights semantics:
# kaiming_uniform(fan_in, leaky_relu) weights, bias = 0.01)
# ----------------------------------------------------------------------------
def init_linear(key, fan_in, fan_out):
    gain = math.sqrt(2.0 / (1.0 + 0.01 ** 2))
    bound = gain * math.sqrt(3.0 / fan_in)
    w = jax.random.uniform(key, (fan_in, fan_out), dtype=jnp.float32,
                           minval=-bound, maxval=bound)
    b = jnp.full((1, fan_out), 0.01, dtype=jnp.float32)
    return w, b


def init_head(key, state_dim, hidden, out_dim):
    k1, k2, k3 = jax.random.split(key, 3)
    w1, b1 = init_linear(k1, state_dim, hidden)
    w2, b2 = init_linear(k2, hidden, hidden)
    w3, b3 = init_linear(k3, hidden, out_dim)
    return (w1, b1, w2, b2, w3, b3)


# ----------------------------------------------------------------------------
# Pure-JAX reference (per-head, unfused) for sanity checking
# ----------------------------------------------------------------------------
def reference_forward(state, params):
    def elu(z):
        return jnp.where(z > 0.0, z, jnp.exp(jnp.minimum(z, 0.0)) - 1.0)

    def mlp3(x, p):
        w1, b1, w2, b2, w3, b3 = p
        h = elu(x @ w1 + b1)
        h = elu(h @ w2 + b2)
        return h @ w3 + b3

    a_p, i_p, e_p = params[0:6], params[6:12], params[12:18]
    logits = mlp3(state, a_p)
    return jax.nn.softmax(logits, axis=-1), mlp3(state, i_p), mlp3(state, e_p)


if __name__ == "__main__":
    # FrozenLake-like sizes: 16 one-hot-ish states, 4 actions, hidden 64.
    batch, state_dim, hidden, action_dim = 8, 16, 64, 4

    key = jax.random.PRNGKey(0)
    k_state, k_actor, k_vin, k_vex = jax.random.split(key, 4)

    state = jax.random.normal(k_state, (batch, state_dim), dtype=jnp.float32)

    actor_params = init_head(k_actor, state_dim, hidden, action_dim)
    vin_params = init_head(k_vin, state_dim, hidden, 1)
    vex_params = init_head(k_vex, state_dim, hidden, 1)
    params = actor_params + vin_params + vex_params

    r_probs, r_vin, r_vex = reference_forward(state, params)

    # ---- f32 path (matches the PyTorch module exactly) ----------------------
    W32, B32, meta = pack_ppo_params(params, state_dim, param_dtype=jnp.float32)
    fwd_f32 = jax.jit(functools.partial(ppo_model_forward, **meta))
    probs, v_in, v_ex = fwd_f32(state, W32, B32)
    jax.block_until_ready((probs, v_in, v_ex))

    assert probs.shape == (batch, action_dim)
    assert v_in.shape == (batch, 1) and v_ex.shape == (batch, 1)
    assert jnp.allclose(probs, r_probs, atol=1e-4), "actor mismatch"
    assert jnp.allclose(v_in, r_vin, atol=1e-4), "value_in mismatch"
    assert jnp.allclose(v_ex, r_vex, atol=1e-4), "value_ex mismatch"
    assert jnp.allclose(jnp.sum(probs, axis=-1), 1.0, atol=1e-4)

    # ---- multi-tile / batch-padding path (grid > 1) --------------------------
    batch2 = 40
    state2 = jax.random.normal(jax.random.PRNGKey(1), (batch2, state_dim),
                               dtype=jnp.float32)
    fwd_tiled = jax.jit(functools.partial(ppo_model_forward, **meta, block_b=16))
    p2, vi2, ve2 = fwd_tiled(state2, W32, B32)
    jax.block_until_ready((p2, vi2, ve2))
    rp2, rvi2, rve2 = reference_forward(state2, params)
    assert p2.shape == (batch2, action_dim)
    assert jnp.allclose(p2, rp2, atol=1e-4)
    assert jnp.allclose(vi2, rvi2, atol=1e-4)
    assert jnp.allclose(ve2, rve2, atol=1e-4)

    # ---- bf16 MXU path (v6e/v7x): weights packed bf16, f32 accumulation,
    #      f32 ELU/softmax, bf16 output slab. Looser tolerances by construction.
    Wbf, Bbf, meta_bf = pack_ppo_params(params, state_dim,
                                        param_dtype=jnp.bfloat16)
    fwd_bf16 = jax.jit(functools.partial(ppo_model_forward, **meta_bf,
                                         out_dtype=jnp.bfloat16))
    pb, vb_in, vb_ex = fwd_bf16(state, Wbf, Bbf)
    jax.block_until_ready((pb, vb_in, vb_ex))
    pb32 = pb.astype(jnp.float32)
    assert bool(jnp.all(jnp.isfinite(pb32)))
    assert jnp.allclose(jnp.sum(pb32, axis=-1), 1.0, atol=3e-2)
    assert jnp.allclose(pb32, r_probs, atol=0.1)
    assert jnp.allclose(vb_in.astype(jnp.float32), r_vin, atol=0.5, rtol=0.1)
    assert jnp.allclose(vb_ex.astype(jnp.float32), r_vex, atol=0.5, rtol=0.1)

    print("KERNEL_OK")
</pallas_src>

<mosaic_0001>
module attributes {stable_mosaic.version = 11 : i64} {
  func.func @ppo_fused_kernel(%arg0: i32, %arg1: memref<8x16xf32, #tpu.memory_space<vmem>>, %arg2: memref<400x192xf32, #tpu.memory_space<vmem>>, %arg3: memref<8x192xf32, #tpu.memory_space<vmem>>, %arg4: memref<8x128xf32, #tpu.memory_space<vmem>>) attributes {dimension_semantics = [#tpu.dimension_semantics<parallel>], iteration_bounds = array<i64: 1>, scalar_prefetch = 0 : i64, scratch_operands = 0 : i64, tpu.core_type = #tpu.core_type<tc>, window_params = [{transform_indices = @transform_0, window_bounds = array<i64: 8, 16>}, {pipeline_mode = #tpu.pipeline_mode<synchronous>, transform_indices = @transform_1, window_bounds = array<i64: 400, 192>}, {pipeline_mode = #tpu.pipeline_mode<synchronous>, transform_indices = @transform_2, window_bounds = array<i64: 8, 192>}, {transform_indices = @transform_3, window_bounds = array<i64: 8, 128>}]} {
    %c0 = arith.constant 0 : index
    %c0_0 = arith.constant 0 : index
    %0 = vector.load %arg1[%c0, %c0_0] : memref<8x16xf32, #tpu.memory_space<vmem>>, vector<8x16xf32>
    %c0_1 = arith.constant 0 : index
    %c0_2 = arith.constant 0 : index
    %1 = vector.load %arg2[%c0_1, %c0_2] : memref<400x192xf32, #tpu.memory_space<vmem>>, vector<16x192xf32>
    %c16 = arith.constant 16 : index
    %c0_3 = arith.constant 0 : index
    %2 = vector.load %arg2[%c16, %c0_3] : memref<400x192xf32, #tpu.memory_space<vmem>>, vector<192x192xf32>
    %c208 = arith.constant 208 : index
    %c0_4 = arith.constant 0 : index
    %3 = vector.load %arg2[%c208, %c0_4] : memref<400x192xf32, #tpu.memory_space<vmem>>, vector<192x128xf32>
    %c0_5 = arith.constant 0 : index
    %c0_6 = arith.constant 0 : index
    %4 = vector.load %arg3[%c0_5, %c0_6] : memref<8x192xf32, #tpu.memory_space<vmem>>, vector<8x192xf32>
    %5 = vector.extract_strided_slice %4 {offsets = [0, 0], sizes = [1, 192], strides = [1, 1]} : vector<8x192xf32> to vector<1x192xf32>
    %6 = vector.extract_strided_slice %4 {offsets = [1, 0], sizes = [1, 192], strides = [1, 1]} : vector<8x192xf32> to vector<1x192xf32>
    %7 = vector.extract_strided_slice %4 {offsets = [2, 0], sizes = [1, 128], strides = [1, 1]} : vector<8x192xf32> to vector<1x128xf32>
    %cst = arith.constant dense<0.000000e+00> : vector<8x192xf32>
    %8 = tpu.matmul %0, %1, %cst {dimension_numbers = #tpu.dot_dimension_numbers<[1], [0], [0], [1], [0, 0, 1, 1], [], []>} : vector<8x16xf32>, vector<16x192xf32>, vector<8x192xf32> -> vector<8x192xf32>
    %9 = vector.broadcast %5 : vector<1x192xf32> to vector<8x192xf32>
    %10 = arith.addf %8, %9 : vector<8x192xf32>
    %cst_7 = arith.constant 0.000000e+00 : f32
    %11 = vector.broadcast %cst_7 : f32 to vector<8x192xf32>
    %12 = arith.cmpf ogt, %10, %11 : vector<8x192xf32>
    %cst_8 = arith.constant 0.000000e+00 : f32
    %13 = vector.broadcast %cst_8 : f32 to vector<8x192xf32>
    %14 = arith.minimumf %10, %13 : vector<8x192xf32>
    %15 = math.exp %14 : vector<8x192xf32>
    %cst_9 = arith.constant 1.000000e+00 : f32
    %16 = vector.broadcast %cst_9 : f32 to vector<8x192xf32>
    %17 = arith.subf %15, %16 : vector<8x192xf32>
    %18 = arith.select %12, %10, %17 : vector<8x192xi1>, vector<8x192xf32>
    %cst_10 = arith.constant dense<0.000000e+00> : vector<8x192xf32>
    %19 = tpu.matmul %18, %2, %cst_10 {dimension_numbers = #tpu.dot_dimension_numbers<[1], [0], [0], [1], [0, 0, 1, 1], [], []>} : vector<8x192xf32>, vector<192x192xf32>, vector<8x192xf32> -> vector<8x192xf32>
    %20 = vector.broadcast %6 : vector<1x192xf32> to vector<8x192xf32>
    %21 = arith.addf %19, %20 : vector<8x192xf32>
    %cst_11 = arith.constant 0.000000e+00 : f32
    %22 = vector.broadcast %cst_11 : f32 to vector<8x192xf32>
    %23 = arith.cmpf ogt, %21, %22 : vector<8x192xf32>
    %cst_12 = arith.constant 0.000000e+00 : f32
    %24 = vector.broadcast %cst_12 : f32 to vector<8x192xf32>
    %25 = arith.minimumf %21, %24 : vector<8x192xf32>
    %26 = math.exp %25 : vector<8x192xf32>
    %cst_13 = arith.constant 1.000000e+00 : f32
    %27 = vector.broadcast %cst_13 : f32 to vector<8x192xf32>
    %28 = arith.subf %26, %27 : vector<8x192xf32>
    %29 = arith.select %23, %21, %28 : vector<8x192xi1>, vector<8x192xf32>
    %cst_14 = arith.constant dense<0.000000e+00> : vector<8x128xf32>
    %30 = tpu.matmul %29, %3, %cst_14 {dimension_numbers = #tpu.dot_dimension_numbers<[1], [0], [0], [1], [0, 0, 1, 1], [], []>} : vector<8x192xf32>, vector<192x128xf32>, vector<8x128xf32> -> vector<8x128xf32>
    %31 = vector.broadcast %7 : vector<1x128xf32> to vector<8x128xf32>
    %32 = arith.addf %30, %31 : vector<8x128xf32>
    %33 = tpu.iota {dimensions = array<i32: 1>} : vector<8x128xi32>
    %c4_i32 = arith.constant 4 : i32
    %34 = vector.broadcast %c4_i32 : i32 to vector<8x128xi32>
    %35 = arith.cmpi slt, %33, %34 : vector<8x128xi32>
    %cst_15 = arith.constant -1.000000e+30 : f32
    %36 = vector.broadcast %cst_15 : f32 to vector<8x128xf32>
    %37 = arith.select %35, %32, %36 : vector<8x128xi1>, vector<8x128xf32>
    %cst_16 = arith.constant dense<0xFF800000> : vector<8xf32>
    %38 = vector.multi_reduction <maximumf>, %37, %cst_16 [1] : vector<8x128xf32> to vector<8xf32>
    %39 = vector.shape_cast %38 : vector<8xf32> to vector<8x1xf32>
    %40 = vector.broadcast %39 : vector<8x1xf32> to vector<8x128xf32>
    %41 = arith.subf %32, %40 : vector<8x128xf32>
    %cst_17 = arith.constant 0.000000e+00 : f32
    %42 = vector.broadcast %cst_17 : f32 to vector<8x128xf32>
    %43 = arith.minimumf %41, %42 : vector<8x128xf32>
    %44 = math.exp %43 : vector<8x128xf32>
    %cst_18 = arith.constant 0.000000e+00 : f32
    %45 = vector.broadcast %cst_18 : f32 to vector<8x128xf32>
    %46 = arith.select %35, %44, %45 : vector<8x128xi1>, vector<8x128xf32>
    %cst_19 = arith.constant dense<0.000000e+00> : vector<8xf32>
    %47 = vector.multi_reduction <add>, %46, %cst_19 [1] : vector<8x128xf32> to vector<8xf32>
    %48 = vector.shape_cast %47 : vector<8xf32> to vector<8x1xf32>
    %49 = tpu.reciprocal %48 {approx = true} : vector<8x1xf32> -> vector<8x1xf32>
    %50 = arith.mulf %48, %49 : vector<8x1xf32>
    %cst_20 = arith.constant 2.000000e+00 : f32
    %51 = vector.broadcast %cst_20 : f32 to vector<8x1xf32>
    %52 = arith.subf %51, %50 : vector<8x1xf32>
    %53 = arith.mulf %49, %52 : vector<8x1xf32>
    %54 = vector.broadcast %53 : vector<8x1xf32> to vector<8x128xf32>
    %55 = arith.mulf %46, %54 : vector<8x128xf32>
    %56 = arith.select %35, %55, %32 : vector<8x128xi1>, vector<8x128xf32>
    %c0_21 = arith.constant 0 : index
    %c0_22 = arith.constant 0 : index
    %57 = vector.load %arg4[%c0_21, %c0_22] : memref<8x128xf32, #tpu.memory_space<vmem>>, vector<8x128xf32>
    tpu.vector_store %arg4[%c0_21, %c0_22], %56 {strides = array<i32>} : memref<8x128xf32, #tpu.memory_space<vmem>>, vector<8x128xf32>,
    return
  }
  func.func @transform_0(%arg0: i32) -> (i32, i32) {
    %c0_i32 = arith.constant 0 : i32
    %c0_i32_0 = arith.constant 0 : i32
    return %arg0, %c0_i32 : i32, i32
  }
  func.func @transform_1(%arg0: i32) -> (i32, i32) {
    %c0_i32 = arith.constant 0 : i32
    %c0_i32_0 = arith.constant 0 : i32
    %c0_i32_1 = arith.constant 0 : i32
    return %c0_i32, %c0_i32_0 : i32, i32
  }
  func.func @transform_2(%arg0: i32) -> (i32, i32) {
    %c0_i32 = arith.constant 0 : i32
    %c0_i32_0 = arith.constant 0 : i32
    %c0_i32_1 = arith.constant 0 : i32
    return %c0_i32, %c0_i32_0 : i32, i32
  }
  func.func @transform_3(%arg0: i32) -> (i32, i32) {
    %c0_i32 = arith.constant 0 : i32
    %c0_i32_0 = arith.constant 0 : i32
    return %arg0, %c0_i32 : i32, i32
  }
}

</mosaic_0001>

<bundles_post_ra>
// kernel: ppo_model_forward.1
= control target key start
LH: loop header
LB: loop body
LE: loop exit
PB: predicated region body
PF: predicated region fallthrough
CT: control target
= control target key end

     0   :  { %vm95_vm0 = vcmask 130048   ;;  %vm153_vm2 = vcmask 523264   ;;  %s613_s1 = inlined_call_operand.vmem [shape: f32[400,192], index: 1, kind: input, shape index: {}]   ;;  %s614_s0 = inlined_call_operand.vmem [shape: f32[8,16], index: 0, kind: input, shape index: {}]   ;;  %s615_s2 = inlined_call_operand.vmem [shape: f32[8,192], index: 2, kind: input, shape index: {}]   ;;  %s616_s3 = inlined_call_operand.vmem [shape: f32[8,128], index: 3, kind: output, shape index: {}]  }
   0x1   :  { %v17_v0 = vld [vmem:[%s613_s1 + $0x10] sm:$0xff]  ;;  %v18_v1 = vld [vmem:[%s613_s1 + $0x18] sm:$0xff]  ;;  %v15_v2 = vld [vmem:[%s613_s1] sm:$0xff] }
   0x2   :  { %113 = vmatpush.msra.mxu0 %v17_v0  ;;  %133 = vmatpush.msra.mxu1 %v18_v1  ;;  %v16_v3 = vld [vmem:[%s613_s1 + $0x8] sm:$0xff]  ;;  %v14_v4 = vld [vmem:[%s614_s0] sm:$0xff]  ;;  %v49_v5 = vld [vmem:[%s613_s1 + $0x110] sm:$0xff] }
   0x3   :  { %157 = vmatpush.msra.mxu2 %v49_v5  ;;  %v50_v6 = vld [vmem:[%s613_s1 + $0x118] sm:$0xff]  ;;  %v47_v7 = vld [vmem:[%s613_s1 + $0x100] sm:$0xff]  ;;  %v48_v8 = vld [vmem:[%s613_s1 + $0x108] sm:$0xff] }
   0x4   :  { %114 = vmatpush.msra.mxu0 %v15_v2  ;;  %134 = vmatpush.msra.mxu1 %v16_v3  ;;  %v45_v9 = vld [vmem:[%s613_s1 + $0xf0] sm:$0xff]  ;;  %v46_v10 = vld [vmem:[%s613_s1 + $0xf8] sm:$0xff]  ;;  %v43_v11 = vld [vmem:[%s613_s1 + $0xe0] sm:$0xff] }
   0x5   :  { %317 = vmatmul.msk.f32.vlgmr.msra.gmra.mxu0 %vm95_vm0, %v14_v4  ;;  %318 = vmatmul.msk.f32.vlgmr.msra.gmra.mxu1 %vm95_vm0, %v14_v4  ;;  %v44_v12 = vld [vmem:[%s613_s1 + $0xe8] sm:$0xff]  ;;  %v41_v13 = vld [vmem:[%s613_s1 + $0xd0] sm:$0xff]  ;;  %v42_v14 = vld [vmem:[%s613_s1 + $0xd8] sm:$0xff] }
   0x6   :  { %197 = vmatpush.msrb.mxu0 %v50_v6  ;;  %158 = vmatpush.msra.mxu2 %v47_v7  ;;  %v39_v15 = vld [vmem:[%s613_s1 + $0xc0] sm:$0xff]  ;;  %v40_v16 = vld [vmem:[%s613_s1 + $0xc8] sm:$0xff]  ;;  %v37_v17 = vld [vmem:[%s613_s1 + $0xb0] sm:$0xff] }
   0x7   :  { %v38_v18 = vld [vmem:[%s613_s1 + $0xb8] sm:$0xff]  ;;  %v35_v19 = vld [vmem:[%s613_s1 + $0xa0] sm:$0xff]  ;;  %v36_v20 = vld [vmem:[%s613_s1 + $0xa8] sm:$0xff] }
   0x8   :  { %198 = vmatpush.msrb.mxu0 %v48_v8  ;;  %159 = vmatpush.msra.mxu2 %v45_v9  ;;  %v33_v21 = vld [vmem:[%s613_s1 + $0x90] sm:$0xff]  ;;  %v34_v23 = vld [vmem:[%s613_s1 + $0x98] sm:$0xff]  ;;  %v31_v25 = vld [vmem:[%s613_s1 + $0x80] sm:$0xff] }
   0x9   :  { %v65_v22 = vld [vmem:[%s613_s1 + $0x190] sm:$0xff]  ;;  %v66_v24 = vld [vmem:[%s613_s1 + $0x198] sm:$0xff]  ;;  %v63_v26 = vld [vmem:[%s613_s1 + $0x180] sm:$0xff] }
   0xa   :  { %199 = vmatpush.msrb.mxu0 %v46_v10  ;;  %160 = vmatpush.msra.mxu2 %v43_v11  ;;  %v32_v27 = vld [vmem:[%s613_s1 + $0x88] sm:$0xff]  ;;  %v29_v29 = vld [vmem:[%s613_s1 + $0x70] sm:$0xff]  ;;  %v30_v31 = vld [vmem:[%s613_s1 + $0x78] sm:$0xff] }
   0xb   :  { %185 = vmatpush.msra.mxu3 %v65_v22  ;;  %225 = vmatpush.msrb.mxu1 %v66_v24  ;;  %v64_v28 = vld [vmem:[%s613_s1 + $0x188] sm:$0xff]  ;;  %v61_v30 = vld [vmem:[%s613_s1 + $0x170] sm:$0xff]  ;;  %v62_v32 = vld [vmem:[%s613_s1 + $0x178] sm:$0xff] }
   0xc   :  { %200 = vmatpush.msrb.mxu0 %v44_v12  ;;  %161 = vmatpush.msra.mxu2 %v41_v13  ;;  %v27_v33 = vld [vmem:[%s613_s1 + $0x60] sm:$0xff]  ;;  %v28_v35 = vld [vmem:[%s613_s1 + $0x68] sm:$0xff]  ;;  %v25_v37 = vld [vmem:[%s613_s1 + $0x50] sm:$0xff] }
   0xd   :  { %186 = vmatpush.msra.mxu3 %v63_v26  ;;  %226 = vmatpush.msrb.mxu1 %v64_v28  ;;  %v59_v34 = vld [vmem:[%s613_s1 + $0x160] sm:$0xff]  ;;  %v60_v36 = vld [vmem:[%s613_s1 + $0x168] sm:$0xff]  ;;  %v57_v38 = vld [vmem:[%s613_s1 + $0x150] sm:$0xff] }
   0xe   :  { %201 = vmatpush.msrb.mxu0 %v42_v14  ;;  %162 = vmatpush.msra.mxu2 %v39_v15  ;;  %v26_v39 = vld [vmem:[%s613_s1 + $0x58] sm:$0xff]  ;;  %v23_v41 = vld [vmem:[%s613_s1 + $0x40] sm:$0xff]  ;;  %v24_v43 = vld [vmem:[%s613_s1 + $0x48] sm:$0xff] }
   0xf   :  { %187 = vmatpush.msra.mxu3 %v61_v30  ;;  %227 = vmatpush.msrb.mxu1 %v62_v32  ;;  %v58_v40 = vld [vmem:[%s613_s1 + $0x158] sm:$0xff]  ;;  %v55_v42 = vld [vmem:[%s613_s1 + $0x140] sm:$0xff]  ;;  %v56_v44 = vld [vmem:[%s613_s1 + $0x148] sm:$0xff] }
  0x10   :  { %202 = vmatpush.msrb.mxu0 %v40_v16  ;;  %163 = vmatpush.msra.mxu2 %v37_v17  ;;  %v21_v45 = vld [vmem:[%s613_s1 + $0x30] sm:$0xff]  ;;  %v22_v47 = vld [vmem:[%s613_s1 + $0x38] sm:$0xff]  ;;  %v19_v49 = vld [vmem:[%s613_s1 + $0x20] sm:$0xff] }
  0x11   :  { %188 = vmatpush.msra.mxu3 %v59_v34  ;;  %228 = vmatpush.msrb.mxu1 %v60_v36  ;;  %v53_v46 = vld [vmem:[%s613_s1 + $0x130] sm:$0xff]  ;;  %v54_v48 = vld [vmem:[%s613_s1 + $0x138] sm:$0xff]  ;;  %v51_v50 = vld [vmem:[%s613_s1 + $0x120] sm:$0xff] }
  0x12   :  { %203 = vmatpush.msrb.mxu0 %v38_v18  ;;  %164 = vmatpush.msra.mxu2 %v35_v19  ;;  %v20_v51 = vld [vmem:[%s613_s1 + $0x28] sm:$0xff]  ;;  %v82_v53 = vld [vmem:[%s613_s1 + $0x290] sm:$0xff]  ;;  %v81_v54 = vld [vmem:[%s613_s1 + $0x280] sm:$0xff] }
  0x13   :  { %189 = vmatpush.msra.mxu3 %v57_v38  ;;  %229 = vmatpush.msrb.mxu1 %v58_v40  ;;  %v52_v52 = vld [vmem:[%s613_s1 + $0x128] sm:$0xff]  ;;  %v80_v55 = vld [vmem:[%s613_s1 + $0x270] sm:$0xff]  ;;  %v529_v56 = vld [vmem:[%s615_s2] sm:$0xff] }
  0x14   :  { %204 = vmatpush.msrb.mxu0 %v36_v20  ;;  %165 = vmatpush.msra.mxu2 %v33_v21  ;;  %v534_v57 = vld [vmem:[%s615_s2 + $0x8] sm:$0xff]  ;;  %v93_v58 = vperm.slane %v529_v56, 0  ;;  %v79_v10 = vld [vmem:[%s613_s1 + $0x260] sm:$0xff]  ;;  %v78_v11 = vld [vmem:[%s613_s1 + $0x250] sm:$0xff]  ;;  %v151_v36 = vperm.slane %v529_v56, 1 }
  0x15   :  { %190 = vmatpush.msra.mxu3 %v55_v42  ;;  %230 = vmatpush.msrb.mxu1 %v56_v44  ;;  %v94_v59 = vperm.slane %v534_v57, 0  ;;  %v77_v12 = vld [vmem:[%s613_s1 + $0x240] sm:$0xff]  ;;  %v90_v13 = vld [vmem:[%s613_s1 + $0x310] sm:$0xff] }
  0x16   :  { %205 = vmatpush.msrb.mxu0 %v34_v23  ;;  %166 = vmatpush.msra.mxu2 %v31_v25  ;;  %v76_v14 = vld [vmem:[%s613_s1 + $0x230] sm:$0xff]  ;;  %v89_v15 = vld [vmem:[%s613_s1 + $0x300] sm:$0xff] }
  0x17   :  { %191 = vmatpush.msra.mxu3 %v53_v46  ;;  %231 = vmatpush.msrb.mxu1 %v54_v48  ;;  %v75_v16 = vld [vmem:[%s613_s1 + $0x220] sm:$0xff]  ;;  %v88_v17 = vld [vmem:[%s613_s1 + $0x2f0] sm:$0xff] }
  0x18   :  { %206 = vmatpush.msrb.mxu0 %v32_v27  ;;  %167 = vmatpush.msra.mxu2 %v29_v29  ;;  %v74_v18 = vld [vmem:[%s613_s1 + $0x210] sm:$0xff]  ;;  %v87_v19 = vld [vmem:[%s613_s1 + $0x2e0] sm:$0xff] }
  0x19   :  { %192 = vmatpush.msra.mxu3 %v51_v50  ;;  %232 = vmatpush.msrb.mxu1 %v52_v52  ;;  %v73_v20 = vld [vmem:[%s613_s1 + $0x200] sm:$0xff]  ;;  %v86_v21 = vld [vmem:[%s613_s1 + $0x2d0] sm:$0xff]  ;;  %v249_v52 = vperm.slane %v529_v56, 2 }
  0x1a   :  { %207 = vmatpush.msrb.mxu0 %v30_v31  ;;  %168 = vmatpush.msra.mxu2 %v27_v33  ;;  %v72_v22 = vld [vmem:[%s613_s1 + $0x1f0] sm:$0xff]  ;;  %v85_v23 = vld [vmem:[%s613_s1 + $0x2c0] sm:$0xff]  ;;  %v152_v31 = vperm.slane %v534_v57, 1 }
  0x1b   :  { %253 = vmatpush.msrb.mxu3 %v82_v53  ;;  %281 = vmatpush.msra.mxu1 %v90_v13  ;;  %v71_v24 = vld [vmem:[%s613_s1 + $0x1e0] sm:$0xff]  ;;  %v84_v25 = vld [vmem:[%s613_s1 + $0x2b0] sm:$0xff] }
  0x1c   :  { %208 = vmatpush.msrb.mxu0 %v28_v35  ;;  %169 = vmatpush.msra.mxu2 %v25_v37  ;;  %v70_v26 = vld [vmem:[%s613_s1 + $0x1d0] sm:$0xff]  ;;  %v83_v27 = vld [vmem:[%s613_s1 + $0x2a0] sm:$0xff] }
  0x1d   :  { %254 = vmatpush.msrb.mxu3 %v81_v54  ;;  %282 = vmatpush.msra.mxu1 %v89_v15  ;;  %v69_v28 = vld [vmem:[%s613_s1 + $0x1c0] sm:$0xff]  ;;  %v68_v29 = vld [vmem:[%s613_s1 + $0x1b0] sm:$0xff] }
  0x1e   :  { %209 = vmatpush.msrb.mxu0 %v26_v39  ;;  %170 = vmatpush.msra.mxu2 %v23_v41  ;;  %v67_v30 = vld [vmem:[%s613_s1 + $0x1a0] sm:$0xff] }
  0x1f   :  { %255 = vmatpush.msrb.mxu3 %v80_v55  ;;  %283 = vmatpush.msra.mxu1 %v88_v17 }
  0x20   :  { %210 = vmatpush.msrb.mxu0 %v24_v43  ;;  %171 = vmatpush.msra.mxu2 %v21_v45 }
  0x21   :  { %256 = vmatpush.msrb.mxu3 %v79_v10  ;;  %284 = vmatpush.msra.mxu1 %v87_v19 }
  0x22   :  { %211 = vmatpush.msrb.mxu0 %v22_v47  ;;  %172 = vmatpush.msra.mxu2 %v19_v49 }
  0x23   :  { %257 = vmatpush.msrb.mxu3 %v78_v11  ;;  %285 = vmatpush.msra.mxu1 %v86_v21 }
  0x24   :  { %212 = vmatpush.msrb.mxu0 %v20_v51  ;;  %v293_v51 = vlaneseq }
  0x25   :  { %258 = vmatpush.msrb.mxu3 %v77_v12  ;;  %286 = vmatpush.msra.mxu1 %v85_v23 }
  0x26   :  { %v294_v53 = vand.u32 127, %v293_v51 }
  0x27   :  { %259 = vmatpush.msrb.mxu3 %v76_v14  ;;  %287 = vmatpush.msra.mxu1 %v84_v25 }
  0x28   :  { %vm295_vm6 = vcmp.lt.s32.totalorder %v294_v53, 4 }
  0x29   :  { %260 = vmatpush.msrb.mxu3 %v75_v16  ;;  %288 = vmatpush.msra.mxu1 %v83_v27 }
  0x2b   :  { %261 = vmatpush.msrb.mxu3 %v74_v18 }
  0x2d   :  { %262 = vmatpush.msrb.mxu3 %v73_v20 }
  0x2f   :  { %263 = vmatpush.msrb.mxu3 %v72_v22 }
  0x31   :  { %264 = vmatpush.msrb.mxu3 %v71_v24 }
  0x33   :  { %265 = vmatpush.msrb.mxu3 %v70_v26 }
  0x35   :  { %266 = vmatpush.msrb.mxu3 %v69_v28 }
  0x37   :  { %267 = vmatpush.msrb.mxu3 %v68_v29 }
  0x39   :  { %268 = vmatpush.msrb.mxu3 %v67_v30 }
  0x82   :  { %v116_v60 = vpop.f32.mrf.mxu0  ;;  %v136_v61 = vpop.f32.mrf.mxu1 }
  0x83   :  { %v117_v62 = vadd.f32 %v116_v60, %v93_v58  ;;  %v137_v63 = vadd.f32 %v136_v61, %v94_v59 }
  0x85   :  { %v141_v0 = vmin.f32 %v117_v62, 0.0  ;;  %v142_v1 = vmin.f32 %v137_v63, 0.0  ;;  %vm139_vm1 = vcmp.gt.f32.partialorder %v117_v62, 0.0  ;;  %vm140_vm3 = vcmp.gt.f32.partialorder %v137_v63, 0.0 }
  0x87   :  { %v143_v2 = vmul.f32 1.442695, %v141_v0  ;;  %v145_v3 = vmul.f32 1.442695, %v142_v1 }
  0x89   :  { %326 = vpow2.f32 %v143_v2 }
  0x8a   :  { %328 = vpow2.f32 %v145_v3 }
  0x8f   :  { %v327_v4 = vpop.eup %326 }
  0x90   :  { %v329_v5 = vpop.eup %328  ;;  %v319_v6 = vadd.f32 -1.0, %v327_v4 }
  0x91   :  { %v320_v7 = vadd.f32 -1.0, %v329_v5 }
  0x92   :  { %v149_v8 = vsel %vm139_vm1, %v117_v62, %v319_v6 }
  0x93   :  { %173 = vmatmul.f32.vlgmr.msra.gmra.mxu2 %v149_v8  ;;  %v150_v9 = vsel %vm140_vm3, %v137_v63, %v320_v7  ;;  %213 = vmatmul.f32.vlgmr.msrb.gmra.mxu0 %v149_v8 }
  0x94   :  { %321 = vmatmul.msk.f32.vlgmr.msra.gmra.mxu3 %vm153_vm2, %v150_v9  ;;  %322 = vmatmul.msk.f32.vlgmr.msrb.gmra.mxu1 %vm153_vm2, %v150_v9 }
 0x110   :  { %v214_v32 = vpop.f32.mrf.mxu0 }
 0x111   :  { %v215_v33 = vadd.f32 %v214_v32, %v152_v31  ;;  %v234_v34 = vpop.f32.mrf.mxu1 }
 0x113   :  { %v235_v35 = vadd.f32 %v234_v34, %v215_v33 }
 0x115   :  { %v240_v37 = vmin.f32 %v235_v35, 0.0  ;;  %vm238_vm4 = vcmp.gt.f32.partialorder %v235_v35, 0.0 }
 0x116   :  { %v174_v38 = vpop.f32.mrf.mxu2 }
 0x117   :  { %v243_v39 = vmul.f32 1.442695, %v240_v37  ;;  %v175_v40 = vadd.f32 %v174_v38, %v151_v36  ;;  %v194_v41 = vpop.f32.mrf.mxu3 }
 0x119   :  { %330 = vpow2.f32 %v243_v39  ;;  %v195_v42 = vadd.f32 %v194_v41, %v175_v40 }
 0x11b   :  { %v239_v43 = vmin.f32 %v195_v42, 0.0  ;;  %vm237_vm5 = vcmp.gt.f32.partialorder %v195_v42, 0.0 }
 0x11d   :  { %v241_v44 = vmul.f32 1.442695, %v239_v43 }
 0x11f   :  { %v331_v45 = vpop.eup %330  ;;  %332 = vpow2.f32 %v241_v44 }
 0x120   :  { %v324_v46 = vadd.f32 -1.0, %v331_v45 }
 0x122   :  { %v248_v47 = vsel %vm238_vm4, %v235_v35, %v324_v46 }
 0x123   :  { %325 = vmatmul.msk.f32.vlgmr.msra.gmra.mxu1 %vm153_vm2, %v248_v47 }
 0x125   :  { %v333_v48 = vpop.eup %332 }
 0x126   :  { %v323_v49 = vadd.f32 -1.0, %v333_v48 }
 0x128   :  { %v247_v50 = vsel %vm237_vm5, %v195_v42, %v323_v49 }
 0x129   :  { %269 = vmatmul.f32.vlgmr.msrb.gmra.mxu3 %v247_v50 }
 0x1a0   :  { %v290_v57 = vpop.f32.mrf.mxu1 }
 0x1ac   :  { %v270_v54 = vpop.f32.mrf.mxu3 }
 0x1ad   :  { %v271_v55 = vadd.f32 %v270_v54, %v249_v52 }
 0x1af   :  { %v291_v58 = vadd.f32 %v290_v57, %v271_v55 }
 0x1b1   :  { %v296_v59 = vsel %vm295_vm6, %v291_v58, -1e+30 }
 0x1b2   :  { %297 = vmax.xlane.f32.xlu0 %v296_v59 }
 0x225   :  { %v298_v60 = vpop.xlane.xlu0 %297 }
 0x226   :  { %v299_v61 = vsub.f32 %v291_v58, %v298_v60 }
 0x228   :  { %v300_v62 = vmin.f32 %v299_v61, 0.0 }
 0x22a   :  { %v301_v63 = vmul.f32 1.442695, %v300_v62 }
 0x22c   :  { %334 = vpow2.f32 %v301_v63 }
 0x232   :  { %v335_v0 = vpop.eup %334 }
 0x233   :  { %v303_v1 = vsel %vm295_vm6, %v335_v0, 0.0 }
 0x234   :  { %304 = vadd.xlane.f32.xlu0 %v303_v1 }
 0x2a7   :  { %v305_v2 = vpop.xlane.xlu0 %304 }
 0x2a8   :  { %336 = vrcp.f32 %v305_v2 }
 0x2ae   :  { %v337_v56 = vpop.eup %336 }
 0x2af   :  { %v307_v3 = vmul.f32 %v337_v56, %v305_v2 }
 0x2b1   :  { %v308_v4 = vsub.f32 2.0, %v307_v3 }
 0x2b3   :  { %v309_v5 = vmul.f32 %v337_v56, %v308_v4 }
 0x2b5   :  { %v310_v6 = vmul.f32 %v309_v5, %v303_v1 }
 0x2b7   :  { %v311_v7 = vsel %vm295_vm6, %v310_v6, %v291_v58 }
 0x2b8   :  { %312 = vst [vmem:[%s616_s3] sm:$0xff] %v311_v7 }

</bundles_post_ra>
